<compile_context>
chip_gen: v6e
topology: v6e:2x2x1
jax: 0.10.0
libtpu: 0.0.40
codegen_flags: <defaults>
</compile_context>

<pallas_src>
import functools

import jax
import jax.numpy as jnp
from jax.experimental import pallas as pl
from jax.experimental.pallas import tpu as pltpu


def _round_up(x, m):
    return (x + m - 1) // m * m


def _pool_kernel(x_ref, sum_ref, max_ref, *, hw_true, hw_tile):
    """Accumulate spatial sum and max of one (1, C_pad, hw_tile) block of x."""
    t = pl.program_id(1)
    x = x_ref[0].astype(jnp.float32)                       # (C_pad, hw_tile)

    # Wrapper zero-pads HW, which is fine for the sum but would corrupt the max
    # when all real values are negative -> mask padded lanes for the max path.
    lane = jax.lax.broadcasted_iota(jnp.int32, x.shape, dimension=1)
    valid = (t * hw_tile + lane) < hw_true

    part_sum = jnp.sum(x, axis=-1).reshape(1, 1, -1)                       # (1,1,C_pad)
    part_max = jnp.max(jnp.where(valid, x, -jnp.inf), axis=-1).reshape(1, 1, -1)

    @pl.when(t == 0)
    def _():
        sum_ref[...] = part_sum
        max_ref[...] = part_max

    @pl.when(t != 0)
    def _():
        sum_ref[...] = sum_ref[...] + part_sum
        max_ref[...] = jnp.maximum(max_ref[...], part_max)


def _mlp_kernel(sum_ref, max_ref, w1t_ref, w2t_ref, out_ref, *, inv_hw):
    """sigmoid(MLP(avg) + MLP(max)) with the shared MLP batched over B."""
    b, _, c_pad = sum_ref.shape
    avg = sum_ref[...].reshape(b, c_pad) * jnp.float32(inv_hw)
    mx = max_ref[...].reshape(b, c_pad)
    w1t = w1t_ref[...]                                     # (C_pad, M_pad)
    w2t = w2t_ref[...]                                     # (M_pad, C_pad)

    def mlp(v):
        h = jnp.maximum(jnp.dot(v, w1t, preferred_element_type=jnp.float32), 0.0)
        return jnp.dot(h, w2t, preferred_element_type=jnp.float32)

    out_ref[...] = jax.nn.sigmoid(mlp(avg) + mlp(mx)).astype(out_ref.dtype)


def region_channel_attention(x, params, *, hw_tile=512):
    """x: (B, C, H, W). params: (w1t, w2t) = ((C, mid), (mid, C)). Returns (B, C, 1, 1)."""
    w1t, w2t = params
    B, C, H, W = x.shape
    HW = H * W
    mid = w1t.shape[1]

    C_pad = _round_up(C, 8)                    # sublane alignment for the x tiles
    M_pad = _round_up(mid, 128)                # lane alignment for the tiny MLP weights
    hw_tile = max(128, _round_up(min(hw_tile, HW), 128))   # lane-dense spatial tile
    HW_pad = _round_up(HW, hw_tile)
    n_t = HW_pad // hw_tile

    x_p = jnp.pad(x.reshape(B, C, HW),
                  ((0, 0), (0, C_pad - C), (0, HW_pad - HW)))
    w1t_p = jnp.pad(w1t.astype(jnp.float32), ((0, C_pad - C), (0, M_pad - mid)))
    w2t_p = jnp.pad(w2t.astype(jnp.float32), ((0, M_pad - mid), (0, C_pad - C)))

    # Pass 1: streaming pooling (sum + max) over x, tiled over (B, HW).
    pooled_sum, pooled_max = pl.pallas_call(
        functools.partial(_pool_kernel, hw_true=HW, hw_tile=hw_tile),
        out_shape=(
            jax.ShapeDtypeStruct((B, 1, C_pad), jnp.float32),
            jax.ShapeDtypeStruct((B, 1, C_pad), jnp.float32),
        ),
        grid=(B, n_t),
        in_specs=[pl.BlockSpec((1, C_pad, hw_tile), lambda b, t: (b, 0, t))],
        out_specs=(
            pl.BlockSpec((1, 1, C_pad), lambda b, t: (b, 0, 0)),
            pl.BlockSpec((1, 1, C_pad), lambda b, t: (b, 0, 0)),
        ),
        compiler_params=pltpu.CompilerParams(
            dimension_semantics=("parallel", "arbitrary"),
            vmem_limit_bytes=32 * 1024 * 1024,
        ),
    )(x_p)

    # Pass 2: tiny shared MLP + sigmoid, batched over B (single grid step).
    att = pl.pallas_call(
        functools.partial(_mlp_kernel, inv_hw=1.0 / HW),
        out_shape=jax.ShapeDtypeStruct((B, C_pad), jnp.float32),
    )(pooled_sum, pooled_max, w1t_p, w2t_p)

    return att[:, :C].reshape(B, C, 1, 1).astype(x.dtype)


def init_params(key, channel, reduction=16):
    """Synthetic weights matching sharedMLP's 1x1 conv shapes (bias=False)."""
    mid = max(channel // reduction, 1)
    k1, k2 = jax.random.split(key)
    w1 = 0.3 * jax.random.normal(k1, (mid, channel), jnp.float32)  # conv1.weight[:, :, 0, 0]
    w2 = 0.3 * jax.random.normal(k2, (channel, mid), jnp.float32)  # conv2.weight[:, :, 0, 0]
    return w1.T, w2.T                                              # (C, mid), (mid, C)


def ref_forward(x, params):
    """Pure-JAX reference mirroring the PyTorch forward."""
    w1t, w2t = params
    xf = x.astype(jnp.float32)
    avg = jnp.mean(xf, axis=(2, 3))                                # (B, C)
    mx = jnp.max(xf, axis=(2, 3))                                  # (B, C)
    mlp = lambda v: jnp.maximum(v @ w1t, 0.0) @ w2t
    out = jax.nn.sigmoid(mlp(avg) + mlp(mx))
    return out[:, :, None, None].astype(x.dtype)


if __name__ == "__main__":
    B, C, H, W = 2, 32, 16, 16          # C >= reduction so C // 16 >= 1
    key = jax.random.PRNGKey(0)
    kx, kp = jax.random.split(key)
    x = jax.random.normal(kx, (B, C, H, W), jnp.float32)
    params = init_params(kp, C, reduction=16)

    # hw_tile=128 -> 2 spatial tiles per batch element, exercising accumulation.
    out = jax.block_until_ready(region_channel_attention(x, params, hw_tile=128))
    ref = ref_forward(x, params)

    assert out.shape == (B, C, 1, 1)
    err = float(jnp.max(jnp.abs(out - ref)))
    assert jnp.allclose(out, ref, atol=1e-4, rtol=1e-4), err
    print("KERNEL_OK")
</pallas_src>

<mosaic_0001>
module attributes {stable_mosaic.version = 11 : i64} {
  func.func @_pool_kernel(%arg0: i32, %arg1: i32, %arg2: memref<1x32x128xf32, #tpu.memory_space<vmem>>, %arg3: memref<1x1x32xf32, #tpu.memory_space<vmem>>, %arg4: memref<1x1x32xf32, #tpu.memory_space<vmem>>) attributes {dimension_semantics = [#tpu.dimension_semantics<parallel>, #tpu.dimension_semantics<arbitrary>], iteration_bounds = array<i64: 2, 2>, scalar_prefetch = 0 : i64, scratch_operands = 0 : i64, tpu.core_type = #tpu.core_type<tc>, window_params = [{transform_indices = @transform_0, window_bounds = array<i64: 1, 32, 128>}, {transform_indices = @transform_1, window_bounds = array<i64: 1, 1, 32>}, {transform_indices = @transform_2, window_bounds = array<i64: 1, 1, 32>}]} {
    %c0 = arith.constant 0 : index
    %c0_0 = arith.constant 0 : index
    %c0_1 = arith.constant 0 : index
    %0 = vector.load %arg2[%c0, %c0_0, %c0_1] : memref<1x32x128xf32, #tpu.memory_space<vmem>>, vector<1x32x128xf32>
    %1 = vector.shape_cast %0 : vector<1x32x128xf32> to vector<32x128xf32>
    %2 = tpu.iota {dimensions = array<i32: 1>} : vector<32x128xi32>
    %c128_i32 = arith.constant 128 : i32
    %3 = arith.muli %arg1, %c128_i32 : i32
    %4 = vector.broadcast %3 : i32 to vector<32x128xi32>
    %5 = arith.addi %4, %2 : vector<32x128xi32>
    %c256_i32 = arith.constant 256 : i32
    %6 = vector.broadcast %c256_i32 : i32 to vector<32x128xi32>
    %7 = arith.cmpi slt, %5, %6 : vector<32x128xi32>
    %cst = arith.constant dense<0.000000e+00> : vector<32xf32>
    %8 = vector.multi_reduction <add>, %1, %cst [1] : vector<32x128xf32> to vector<32xf32>
    %9 = vector.shape_cast %8 : vector<32xf32> to vector<1x1x32xf32>
    %cst_2 = arith.constant 0xFF800000 : f32
    %10 = vector.broadcast %cst_2 : f32 to vector<32x128xf32>
    %11 = arith.select %7, %1, %10 : vector<32x128xi1>, vector<32x128xf32>
    %cst_3 = arith.constant dense<0xFF800000> : vector<32xf32>
    %12 = vector.multi_reduction <maximumf>, %11, %cst_3 [1] : vector<32x128xf32> to vector<32xf32>
    %13 = vector.shape_cast %12 : vector<32xf32> to vector<1x1x32xf32>
    %c0_i32 = arith.constant 0 : i32
    %14 = arith.cmpi eq, %arg1, %c0_i32 : i32
    %15 = arith.extui %14 : i1 to i32
    %c0_i32_4 = arith.constant 0 : i32
    %16 = arith.cmpi ne, %15, %c0_i32_4 : i32
    scf.if %16 {
      %c0_7 = arith.constant 0 : index
      %c0_8 = arith.constant 0 : index
      %c0_9 = arith.constant 0 : index
      %20 = vector.load %arg3[%c0_7, %c0_8, %c0_9] : memref<1x1x32xf32, #tpu.memory_space<vmem>>, vector<1x1x32xf32>
      tpu.vector_store %arg3[%c0_7, %c0_8, %c0_9], %9 {strides = array<i32>} : memref<1x1x32xf32, #tpu.memory_space<vmem>>, vector<1x1x32xf32>,
      %c0_10 = arith.constant 0 : index
      %c0_11 = arith.constant 0 : index
      %c0_12 = arith.constant 0 : index
      %21 = vector.load %arg4[%c0_10, %c0_11, %c0_12] : memref<1x1x32xf32, #tpu.memory_space<vmem>>, vector<1x1x32xf32>
      tpu.vector_store %arg4[%c0_10, %c0_11, %c0_12], %13 {strides = array<i32>} : memref<1x1x32xf32, #tpu.memory_space<vmem>>, vector<1x1x32xf32>,
    } else {
    }
    %c0_i32_5 = arith.constant 0 : i32
    %17 = arith.cmpi ne, %arg1, %c0_i32_5 : i32
    %18 = arith.extui %17 : i1 to i32
    %c0_i32_6 = arith.constant 0 : i32
    %19 = arith.cmpi ne, %18, %c0_i32_6 : i32
    scf.if %19 {
      %c0_7 = arith.constant 0 : index
      %c0_8 = arith.constant 0 : index
      %c0_9 = arith.constant 0 : index
      %20 = vector.load %arg3[%c0_7, %c0_8, %c0_9] : memref<1x1x32xf32, #tpu.memory_space<vmem>>, vector<1x1x32xf32>
      %21 = arith.addf %20, %9 : vector<1x1x32xf32>
      %c0_10 = arith.constant 0 : index
      %c0_11 = arith.constant 0 : index
      %c0_12 = arith.constant 0 : index
      %22 = vector.load %arg3[%c0_10, %c0_11, %c0_12] : memref<1x1x32xf32, #tpu.memory_space<vmem>>, vector<1x1x32xf32>
      tpu.vector_store %arg3[%c0_10, %c0_11, %c0_12], %21 {strides = array<i32>} : memref<1x1x32xf32, #tpu.memory_space<vmem>>, vector<1x1x32xf32>,
      %c0_13 = arith.constant 0 : index
      %c0_14 = arith.constant 0 : index
      %c0_15 = arith.constant 0 : index
      %23 = vector.load %arg4[%c0_13, %c0_14, %c0_15] : memref<1x1x32xf32, #tpu.memory_space<vmem>>, vector<1x1x32xf32>
      %24 = arith.maximumf %23, %13 : vector<1x1x32xf32>
      %c0_16 = arith.constant 0 : index
      %c0_17 = arith.constant 0 : index
      %c0_18 = arith.constant 0 : index
      %25 = vector.load %arg4[%c0_16, %c0_17, %c0_18] : memref<1x1x32xf32, #tpu.memory_space<vmem>>, vector<1x1x32xf32>
      tpu.vector_store %arg4[%c0_16, %c0_17, %c0_18], %24 {strides = array<i32>} : memref<1x1x32xf32, #tpu.memory_space<vmem>>, vector<1x1x32xf32>,
    } else {
    }
    return
  }
  func.func @transform_0(%arg0: i32, %arg1: i32) -> (i32, i32, i32) {
    %c0_i32 = arith.constant 0 : i32
    %c0_i32_0 = arith.constant 0 : i32
    return %arg0, %c0_i32, %arg1 : i32, i32, i32
  }
  func.func @transform_1(%arg0: i32, %arg1: i32) -> (i32, i32, i32) {
    %c0_i32 = arith.constant 0 : i32
    %c0_i32_0 = arith.constant 0 : i32
    %c0_i32_1 = arith.constant 0 : i32
    return %arg0, %c0_i32, %c0_i32_0 : i32, i32, i32
  }
  func.func @transform_2(%arg0: i32, %arg1: i32) -> (i32, i32, i32) {
    %c0_i32 = arith.constant 0 : i32
    %c0_i32_0 = arith.constant 0 : i32
    %c0_i32_1 = arith.constant 0 : i32
    return %arg0, %c0_i32, %c0_i32_0 : i32, i32, i32
  }
}

</mosaic_0001>

<bundles_post_ra>
// kernel: tpu_custom_call.1
= control target key start
LH: loop header
LB: loop body
LE: loop exit
PB: predicated region body
PF: predicated region fallthrough
CT: control target
= control target key end

     0   :  { %8 = vsyncpa [#allocation3], 0  ;;  %s1989_s0 = inlined_call_operand.hbm [shape: f32[2,32,256], index: 0, kind: input, shape index: {}]   ;;  %s1990_s1 = inlined_call_operand.hbm [shape: f32[2,1,32], index: 1, kind: output, shape index: {0}]   ;;  %s1991_s2 = inlined_call_operand.hbm [shape: f32[2,1,32], index: 2, kind: output, shape index: {1}]  }
   0x1   :  { %10 = vsyncpa [#allocation3 + $0x1], 0 }
   0x2   :  { %11 = vsyncpa [#allocation4], 0 }
   0x3   :  { %13 = vsyncpa [#allocation4 + $0x1], 0 }
   0x4   :  { %14 = vsyncpa [#allocation7], 0 }
   0x5   :  { %16 = vsyncpa [#allocation7 + $0x1], 0  ;;  %s1512_s9 = smov 0   ;;  %s1514_s10 = smov 0  }
   0x6   :  { %s1516_s11 = smov 0   ;;  %s1518_s12 = smov 0  }
   0x7   :  { %s1520_s13 = smov 0   ;;  %s1522_s14 = smov 0  }
   0x8   :  { %s1524_s15 = smov 0   ;;  %s1526_s16 = smov 0  }
   0x9   :  { %s1528_s17 = smov 0   ;;  %s1530_s18 = smov 0  }
   0xa   :  { %s1532_s19 = smov 0  }
   0xb LB: > { %s1179_s20 = sadd.s32 4294967295, %s1487_s19   ;;  %s1180_s21 = sadd.s32 4294967294, %s1487_s19   ;;  %s1487_s19 = sphi %s1532_s19, %s22_s19   ;;  %s1483_s18 = sphi %s1530_s18, %s2014_s18   ;;  %s1479_s17 = sphi %s1528_s17, %s2013_s17   ;;  %s1475_s16 = sphi %s1526_s16, %s2012_s16   ;;  %s1471_s15 = sphi %s1524_s15, %s2011_s15   ;;  %s1467_s14 = sphi %s1522_s14, %s2010_s14   ;;  %s1463_s13 = sphi %s1520_s13, %s2009_s13   ;;  %s1459_s12 = sphi %s1518_s12, %s2008_s12   ;;  %s1455_s11 = sphi %s1516_s11, %s2007_s11   ;;  %s1451_s10 = sphi %s1514_s10, %s2006_s10   ;;  %s1447_s9 = sphi %s1512_s9, %s2005_s9  }
   0xc   : > { %s31_s22 = sadd.s32 1, %s1479_s17  ;;  %s34_s23 = sadd.s32 1, %s1483_s18 }
   0xd   : > { %p32_p0 = scmp.ge.s32.totalorder %s31_s22, 2  ;;  %s43_s24 = sadd.s32 1, %s1467_s14 }
   0xe   : > { %p50_p1 = scmp.ne.s32.totalorder %s1467_s14, %s1463_s13  ;;  %p51_p2 = scmp.eq.s32.totalorder %s1487_s19, 0 }
   0xf   : > { %s2016_s22 = smov (%p32_p0, %s31_s22), 0  ;;  %s2018_s23 = smov (!%p32_p0, %s34_s23), %s1483_s18 }
  0x10   : > { %1994 = sst [smem:[#allocation11_spill]] %s2016_s22  ;;  %s39_s25 = ssub.s32 %s1479_s17, %s2016_s22 }
  0x11   : > { %p1578_p3 = por %p51_p2, %p50_p1  ;;  %p36_p4 = scmp.ge.s32.totalorder %s2018_s23, 2 }
  0x12   : > { %p56_p5 = scmp.ne.s32.totalorder %s1463_s13, %s1459_s12  ;;  %p57_p6 = scmp.eq.s32.totalorder %s1179_s20, 0 }
  0x13   : > { %s69_s27 = sadd.s32 1, %s1455_s11  ;;  %s2020_s23 = smov (%p36_p4, %s2018_s23), 0 }
  0x14   : > { %1996 = sst [smem:[#allocation12_spill]] %s2020_s23  ;;  %p1586_p7 = por %p57_p6, %p56_p5 }
  0x15   : > { %p79_p8 = scmp.ne.s32.totalorder %s1455_s11, %s1451_s10  ;;  %s38_s29 = ssub.s32 %s1483_s18, %s2020_s23 }
  0x16   : > { %p80_p9 = scmp.eq.s32.totalorder %s1179_s20, 3  ;;  %s40_s30 = sor.u32 %s39_s25, %s38_s29 }
  0x17   : > { %p67_p10 = scmp.eq.s32.totalorder %s38_s29, 0  ;;  %p41_p11 = scmp.eq.s32.totalorder %s40_s30, 0 }
  0x18   : > { %p1594_p12 = por %p80_p9, %p79_p8  ;;  %p85_p13 = scmp.ne.s32.totalorder %s1451_s10, %s1447_s9 }
  0x19   : > { %s1599_s4 = scalar_select %p67_p10, %s1455_s11, %s69_s27  }
  0x1a   : > { %s1602_s5 = scalar_select %p41_p11, %s1467_s14, %s43_s24  }
  0x1b   : > { %p86_p0 = scmp.eq.s32.totalorder %s1180_s21, 3  ;;  %p1212_p1 = scmp.lt.s32.totalorder %s1487_s19, 4 }
  0x1c   : > { %1999 = sst [smem:[#allocation13_spill]] %s1602_s5  ;;  %s132_s7 = sand.u32 1, %s1467_s14  }
  0x1d   : > { %p1607_p2 = por %p86_p0, %p85_p13  ;;  %s1183_s8 = sshll.u32 %s132_s7, 5 }
  0x1e   : > { %s1184_s12 = sshll.u32 %s1483_s18, 3  ;;  %s136_s25 = scalar_lea.vmem [#allocation2], %s1183_s8 }
  0x1f   : > { %s141_s20 = sadd.s32 %s1479_s17, %s1184_s12  ;;  %s144_s29 = sshll.u32 %s136_s25, 4  ;;  %s145_s29 = int_to_ptr.vmem [resolvable:$true] %s144_s29 }
  0x20   : > { %s1185_s30 = sshll.u32 %s141_s20, 7  ;;  %p1619_p4 = pnand %p1212_p1, %p1578_p3 }
  0x21   : > { %s143_s24 = scalar_lea.hbm %s1989_s0, %s1185_s30  ;;  %s133_s22 = scalar_lea.sflag [#allocation3], %s132_s7 }
  0x22   : > { %p1311_p5 = pneg %p1619_p4  ;;  %s1322_s5 = scalar_lea.vmem %s145_s29, 512 }
  0x23   : > { %p1323_p6 = scmp.ne.s32.totalorder %s145_s29, %s1322_s5  ;;  %s1489_s8 = smov [#allocation2]  }
  0x24   : > { %s1327_s12 = sshll.u32 %s1489_s8, 4  ;;  %s1328_s12 = int_to_ptr.vmem [resolvable:$false] %s1327_s12 }
  0x25   : > { %p1325_p8 = pnand %p1323_p6, %p1311_p5  ;;  %s1329_s20 = scalar_lea.vmem %s1328_s12, 1024 }
  0x26   : > { %p1330_p10 = scmp.lt.s32.totalorder %s145_s29, %s1328_s12  ;;  %p1331_p11 = scmp.lt.s32.totalorder %s1329_s20, %s1322_s5 }
  0x27   : > { %p1326_p9 = pneg %p1325_p8 }
  0x28   : > { %p1332_p13 = por %p1331_p11, %p1330_p10 }
  0x2a   : > { %p1333_p0 = pnand %p1332_p13, %p1326_p9 }
  0x2c   : > { %1336 = shalt.err (!%p1333_p0)
}
  0x2d   : > { %s1490_s23 = smov 256   ;;  %s1491_s26 = smov 128  }
  0x2e   : > { %s1492_s7 = smov 8   ;;  %p1186_p3 = scmp.ge.s32.totalorder %s1487_s19, 1 }
  0x2f   : > { %1204 = dma.hbm_to_vmem [thread:$0]  (!%p1619_p4), %s143_s24, 512, %s145_s29, %s133_s22, %s1490_s23, %s1491_s26, %s1492_s7  }
  0x30   : > { %p152_p1 = scmp.lt.s32.totalorder %s1487_s19, 5 }
  0x32   : > { %p153_p5 = pnand %p1186_p3, %p152_p1 }
  0x33   : > { %s158_s25 = sand.u32 (!%p153_p5), 1, %s1463_s13  }
  0x34   : > { %156 = sbr.rel (%p153_p5) target bundleno = 461 (0x1cd), region = 24  ;;  %s1187_s30 = sshll.u32 (!%p153_p5), %s158_s25, 5 }
  0x35   : > { %s159_s5 = scalar_lea.sflag (!%p153_p5), [#allocation3], %s158_s25  ;;  %s162_s27 = scalar_lea.vmem (!%p153_p5), [#allocation2], %s1187_s30 }
  0x39   : > { %1434 = dma.done.wait (%p1586_p7), %s159_s5, 512  }
  0x3a   : > { %1436 = vsyncadd (%p1586_p7), %s159_s5, 4294966784  ;;  %v190_v0 = vlaneseq  ;;  %s1188_s8 = sshll.u32 %s1471_s15, 7  ;;  %v188_v4 = vld [vmem:[%s162_s27 + $0x10] sm:$0xff]  ;;  %v186_v5 = vld [vmem:[%s162_s27] sm:$0xff]  ;;  %s1640_s22 = sand.u32 1, %s1451_s10  }
  0x3b   : > { %v193_v2 = vstv %s1188_s8  ;;  %200 = vadd.xlane.f32.xlu1 %v188_v4  ;;  %196 = vadd.xlane.f32.xlu0 %v186_v5  ;;  %v189_v6 = vld [vmem:[%s162_s27 + $0x18] sm:$0xff]  ;;  %v187_v7 = vld [vmem:[%s162_s27 + $0x8] sm:$0xff]  ;;  %s1659_s28 = scalar_lea.vmem [#allocation5], %s1640_s22  ;;  %s1662_s29 = scalar_lea.vmem [#allocation6], %s1640_s22 }
  0x3c   : > { %v1636_v1 = vand.u32 127, %v190_v0  ;;  %p1189_p7 = scmp.ne.s32.totalorder %s1471_s15, 0 }
  0x3e   : > { %v194_v3 = vadd.s32 %v193_v2, %v1636_v1 }
  0x3f   : > { %202 = vadd.xlane.f32.xlu1 %v189_v6  ;;  %198 = vadd.xlane.f32.xlu0 %v187_v7 }
  0x40   : > { %vm195_vm0 = vcmp.lt.s32.totalorder %v194_v3, 256 }
  0x41   : > { %v205_v8 = vsel %vm195_vm0, %v187_v7, -inf  ;;  %v204_v9 = vsel %vm195_vm0, %v186_v5, -inf  ;;  %v207_v10 = vsel %vm195_vm0, %v189_v6, -inf  ;;  %v206_v11 = vsel %vm195_vm0, %v188_v4, -inf }
  0x43   : > { %210 = vmax.xlane.f32.xlu1 %v205_v8  ;;  %208 = vmax.xlane.f32.xlu0 %v204_v9 }
  0x47   : > { %214 = vmax.xlane.f32.xlu1 %v207_v10  ;;  %212 = vmax.xlane.f32.xlu0 %v206_v11 }
  0xc4   : > { %v1642_v12 = vpop.xlane.xlu1 %200  ;;  %v1644_v13 = vpop.xlane.xlu0 %196 }
  0xc8   : > { %v1646_v14 = vpop.xlane.xlu1 %202  ;;  %v1648_v15 = vpop.xlane.xlu0 %198 }
  0xcc   : > { %v1650_v16 = vpop.xlane.xlu1 %210  ;;  %v1652_v17 = vpop.xlane.xlu0 %208  ;;  %219 = sbr.rel (%p1189_p7) target bundleno = 220 (0xdc), region = 32 }
  0xd0   : > { %v1654_v18 = vpop.xlane.xlu1 %214  ;;  %v1656_v19 = vpop.xlane.xlu0 %212 }
  0xd1   : > { %v225_v20 = vshrl.u32 %v190_v0, 7  ;;  %v228_v21 = vadd.s32 4294967288, %v1636_v1  ;;  %v235_v22 = vadd.s32 4294967280, %v1636_v1  ;;  %v242_v23 = vadd.s32 4294967272, %v1636_v1 }
  0xd2   : > { %vm233_vm1 = vcmask 130112   ;;  %vm240_vm2 = vcmask 195712   ;;  %vm247_vm3 = vcmask 261312   ;;  %vm250_vm4 = vcmask 253952  }
  0xd3   : > { %v226_v24 = vsub.s32 %v1636_v1, %v225_v20  ;;  %v231_v25 = vsub.s32 %v228_v21, %v225_v20  ;;  %v238_v26 = vsub.s32 %v235_v22, %v225_v20  ;;  %v245_v27 = vsub.s32 %v242_v23, %v225_v20 }
  0xd5   : > { %v227_v28 = vrot.slane %v1644_v13, %v226_v24  ;;  %v232_v29 = vrot.slane %v1648_v15, %v231_v25  ;;  %v239_v30 = vrot.slane %v1642_v12, %v238_v26  ;;  %v259_v31 = vrot.slane %v1652_v17, %v226_v24 }
  0xd6   : > { %v246_v32 = vrot.slane %v1646_v14, %v245_v27  ;;  %v263_v33 = vrot.slane %v1650_v16, %v231_v25  ;;  %v268_v34 = vrot.slane %v1656_v19, %v238_v26  ;;  %v273_v35 = vrot.slane %v1654_v18, %v245_v27 }
  0xd7   : > { %v234_v36 = vsel %vm233_vm1, %v232_v29, %v227_v28 }
  0xd8   : > { %v241_v37 = vsel %vm240_vm2, %v239_v30, %v234_v36  ;;  %v264_v38 = vsel %vm233_vm1, %v263_v33, %v259_v31 }
  0xd9   : > { %v248_v39 = vsel %vm247_vm3, %v246_v32, %v241_v37  ;;  %v269_v40 = vsel %vm240_vm2, %v268_v34, %v264_v38 }
  0xda   : > { %251 = vst.msk [vmem:[%s1659_s28] sm:$0x1] %vm250_vm4, %v248_v39  ;;  %v274_v41 = vsel %vm247_vm3, %v273_v35, %v269_v40 }
  0xdb   : > { %276 = vst.msk [vmem:[%s1662_s29] sm:$0x1] %vm250_vm4, %v274_v41 }
  0xdc PF: > { %p1190_p4 = scmp.eq.s32.totalorder %s1471_s15, 0 }
  0xde   : > { %280 = sbr.rel (%p1190_p4) target bundleno = 415 (0x19f), region = 36 }
  0xe3   : > { %v1686_v42 = vshrl.u32 %v190_v0, 7  ;;  %v1493_v43 = vmov 0   ;;  %v1494_v44 = vmov 1966171168   ;;  %vm631_vm5 = vcmask 130112  }
  0xe4   : > { %1308 = vset.pattern.permute.xlu1 %v1493_v43  ;;  %1307 = vset.pattern.permute.xlu0 %v1493_v43  ;;  %v419_v45 = vunpack.c.l.s4 %v1494_v44  ;;  %vm638_vm6 = vcmask 195712   ;;  %vm645_vm7 = vcmask 261312   ;;  %vm663_vm8 = vcmask 253952  }
  0xe5   : > { %v1689_v46 = vsub.s32 0, %v1686_v42  ;;  %v1692_v47 = vsub.s32 1, %v1686_v42  ;;  %v1695_v48 = vsub.s32 2, %v1686_v42  ;;  %v1698_v49 = vsub.s32 3, %v1686_v42 }
  0xe6   : > { %v1701_v50 = vsub.s32 4, %v1686_v42  ;;  %v1704_v51 = vsub.s32 5, %v1686_v42  ;;  %v1707_v52 = vsub.s32 6, %v1686_v42  ;;  %v1710_v53 = vsub.s32 7, %v1686_v42 }
  0xe7   : > { %v420_v54 = vunpack.c.0.s8 %v419_v45  ;;  %v673_v55 = vrot.slane %v1652_v17, %v1689_v46  ;;  %v677_v56 = vrot.slane %v1652_v17, %v1692_v47  ;;  %v681_v57 = vrot.slane %v1652_v17, %v1695_v48 }
  0xe8   : > { %v685_v58 = vrot.slane %v1652_v17, %v1698_v49  ;;  %v689_v59 = vrot.slane %v1652_v17, %v1701_v50  ;;  %v693_v60 = vrot.slane %v1652_v17, %v1704_v51  ;;  %v697_v61 = vrot.slane %v1652_v17, %v1707_v52 }
  0xe9   : > { %v1727_v62 = vsub.s32 %v420_v54, %v1686_v42  ;;  %v701_v63 = vrot.slane %v1652_v17, %v1710_v53  ;;  %v798_v0 = vcombine.low %v673_v55, %v677_v56  ;;  %v289_v2 = vrot.slane %v1644_v13, %v1689_v46 }
  0xea   : > { %v799_v3 = vcombine.low %v681_v57, %v685_v58  ;;  %v800_v4 = vcombine.low %v689_v59, %v693_v60  ;;  %v293_v5 = vrot.slane %v1644_v13, %v1692_v47  ;;  %v297_v6 = vrot.slane %v1644_v13, %v1695_v48 }
  0xeb   : > { %v801_v7 = vcombine.low %v697_v61, %v701_v63  ;;  %v808_v8 = vrot.slane %v798_v0, %v1727_v62  ;;  %v301_v9 = vrot.slane %v1644_v13, %v1698_v49  ;;  %v305_v10 = vrot.slane %v1644_v13, %v1701_v50 }
  0xec   : > { %v815_v11 = vrot.slane %v799_v3, %v1727_v62  ;;  %v822_v17 = vrot.slane %v800_v4, %v1727_v62  ;;  %v309_v20 = vrot.slane %v1644_v13, %v1704_v51  ;;  %v313_v21 = vrot.slane %v1644_v13, %v1707_v52 }
  0xed   : > { %v829_v22 = vrot.slane %v801_v7, %v1727_v62  ;;  %v317_v23 = vrot.slane %v1644_v13, %v1710_v53  ;;  %v414_v24 = vcombine.low %v289_v2, %v293_v5  ;;  %v415_v25 = vcombine.low %v297_v6, %v301_v9 }
  0xee   : > { %v830_v26 = vcombine.low %v808_v8, %v815_v11  ;;  %v416_v27 = vcombine.low %v305_v10, %v309_v20  ;;  %v705_v28 = vrot.slane %v1650_v16, %v1689_v46  ;;  %v709_v29 = vrot.slane %v1650_v16, %v1692_v47 }
  0xef   : > { %v831_v30 = vcombine.low %v822_v17, %v829_v22  ;;  %v417_v31 = vcombine.low %v313_v21, %v317_v23  ;;  %v424_v32 = vrot.slane %v414_v24, %v1727_v62  ;;  %v431_v33 = vrot.slane %v415_v25, %v1727_v62 }
  0xf0   : > { %v838_v34 = vrot.slane %v830_v26, %v1727_v62  ;;  %v438_v13 = vrot.slane %v416_v27, %v1727_v62  ;;  %v713_v35 = vrot.slane %v1650_v16, %v1695_v48  ;;  %v717_v36 = vrot.slane %v1650_v16, %v1698_v49 }
  0xf1   : > { %v845_v37 = vrot.slane %v831_v30, %v1727_v62  ;;  %v445_v38 = vrot.slane %v417_v31, %v1727_v62  ;;  %v446_v39 = vcombine.low %v424_v32, %v431_v33  ;;  %v721_v40 = vrot.slane %v1650_v16, %v1701_v50 }
  0xf2   : > { %v725_v41 = vrot.slane %v1650_v16, %v1704_v51  ;;  %v729_v43 = vrot.slane %v1650_v16, %v1707_v52  ;;  %v733_v44 = vrot.slane %v1650_v16, %v1710_v53  ;;  %v847_v45 = vcombine.low %v705_v28, %v709_v29 }
  0xf3   : > { %v846_v54 = vcombine.low %v838_v34, %v845_v37  ;;  %v447_v55 = vcombine.low %v438_v13, %v445_v38  ;;  %v454_v56 = vrot.slane %v446_v39, %v1727_v62  ;;  %v848_v57 = vcombine.low %v713_v35, %v717_v36 }
  0xf4   : > { %v849_v58 = vcombine.low %v721_v40, %v725_v41  ;;  %v850_v59 = vcombine.low %v729_v43, %v733_v44  ;;  %v857_v60 = vrot.slane %v847_v45, %v1727_v62  ;;  %v321_v61 = vrot.slane %v1648_v15, %v1689_v46 }
  0xf5   : > { %995 = vperm.xlu1 %1308, %v846_v54   ;;  %v461_v63 = vrot.slane %v447_v55, %v1727_v62  ;;  %v864_v0 = vrot.slane %v848_v57, %v1727_v62  ;;  %v325_v16 = vrot.slane %v1648_v15, %v1692_v47  ;;  %v329_v2 = vrot.slane %v1648_v15, %v1695_v48 }
  0xf6   : > { %v871_v3 = vrot.slane %v849_v58, %v1727_v62  ;;  %v878_v4 = vrot.slane %v850_v59, %v1727_v62  ;;  %v333_v5 = vrot.slane %v1648_v15, %v1698_v49  ;;  %v337_v6 = vrot.slane %v1648_v15, %v1701_v50 }
  0xf7   : > { %v462_v7 = vcombine.low %v454_v56, %v461_v63  ;;  %v879_v8 = vcombine.low %v857_v60, %v864_v0  ;;  %v341_v9 = vrot.slane %v1648_v15, %v1704_v51  ;;  %v345_v10 = vrot.slane %v1648_v15, %v1707_v52 }
  0xf8   : > { %v880_v11 = vcombine.low %v871_v3, %v878_v4  ;;  %v349_v17 = vrot.slane %v1648_v15, %v1710_v53  ;;  %v463_v20 = vcombine.low %v321_v61, %v325_v16  ;;  %v464_v21 = vcombine.low %v329_v2, %v333_v5 }
  0xf9   : > { %611 = vperm.xlu0 %1307, %v462_v7   ;;  %v887_v22 = vrot.slane %v879_v8, %v1727_v62  ;;  %v465_v23 = vcombine.low %v337_v6, %v341_v9  ;;  %v737_v24 = vrot.slane %v1656_v19, %v1689_v46  ;;  %v741_v25 = vrot.slane %v1656_v19, %v1692_v47 }
  0xfa   : > { %v894_v26 = vrot.slane %v880_v11, %v1727_v62  ;;  %v466_v27 = vcombine.low %v345_v10, %v349_v17  ;;  %v473_v28 = vrot.slane %v463_v20, %v1727_v62  ;;  %v480_v29 = vrot.slane %v464_v21, %v1727_v62 }
  0xfb   : > { %v487_v15 = vrot.slane %v465_v23, %v1727_v62  ;;  %v745_v30 = vrot.slane %v1656_v19, %v1695_v48  ;;  %v749_v31 = vrot.slane %v1656_v19, %v1698_v49  ;;  %v753_v32 = vrot.slane %v1656_v19, %v1701_v50 }
  0xfc   : > { %v895_v33 = vcombine.low %v887_v22, %v894_v26  ;;  %v494_v34 = vrot.slane %v466_v27, %v1727_v62  ;;  %v495_v13 = vcombine.low %v473_v28, %v480_v29  ;;  %v757_v35 = vrot.slane %v1656_v19, %v1704_v51 }
  0xfd   : > { %v761_v36 = vrot.slane %v1656_v19, %v1707_v52  ;;  %v765_v37 = vrot.slane %v1656_v19, %v1710_v53  ;;  %v896_v38 = vcombine.low %v737_v24, %v741_v25  ;;  %v897_v39 = vcombine.low %v745_v30, %v749_v31 }
  0xfe   : > { %998 = vperm.xlu1 %1308, %v895_v33   ;;  %v496_v40 = vcombine.low %v487_v15, %v494_v34  ;;  %v503_v41 = vrot.slane %v495_v13, %v1727_v62  ;;  %v898_v43 = vcombine.low %v753_v32, %v757_v35  ;;  %v353_v44 = vrot.slane %v1642_v12, %v1689_v46 }
  0xff   : > { %v899_v45 = vcombine.low %v761_v36, %v765_v37  ;;  %v906_v54 = vrot.slane %v896_v38, %v1727_v62  ;;  %v913_v55 = vrot.slane %v897_v39, %v1727_v62  ;;  %v357_v56 = vrot.slane %v1642_v12, %v1692_v47 }
 0x100   : > { %v510_v19 = vrot.slane %v496_v40, %v1727_v62  ;;  %v920_v57 = vrot.slane %v898_v43, %v1727_v62  ;;  %v361_v58 = vrot.slane %v1642_v12, %v1695_v48  ;;  %v365_v59 = vrot.slane %v1642_v12, %v1698_v49 }
 0x101   : > { %v927_v60 = vrot.slane %v899_v45, %v1727_v62  ;;  %v928_v61 = vcombine.low %v906_v54, %v913_v55  ;;  %v369_v63 = vrot.slane %v1642_v12, %v1701_v50  ;;  %v373_v0 = vrot.slane %v1642_v12, %v1704_v51 }
 0x102   : > { %v511_v16 = vcombine.low %v503_v41, %v510_v19  ;;  %v377_v2 = vrot.slane %v1642_v12, %v1707_v52  ;;  %v381_v3 = vrot.slane %v1642_v12, %v1710_v53  ;;  %v512_v4 = vcombine.low %v353_v44, %v357_v56 }
 0x103   : > { %v929_v5 = vcombine.low %v920_v57, %v927_v60  ;;  %v936_v6 = vrot.slane %v928_v61, %v1727_v62  ;;  %v513_v7 = vcombine.low %v361_v58, %v365_v59  ;;  %v514_v8 = vcombine.low %v369_v63, %v373_v0 }
 0x104   : > { %614 = vperm.xlu0 %1307, %v511_v16   ;;  %v515_v9 = vcombine.low %v377_v2, %v381_v3  ;;  %v522_v10 = vrot.slane %v512_v4, %v1727_v62  ;;  %v769_v11 = vrot.slane %v1654_v18, %v1689_v46  ;;  %v773_v17 = vrot.slane %v1654_v18, %v1692_v47 }
 0x105   : > { %v943_v20 = vrot.slane %v929_v5, %v1727_v62  ;;  %v529_v12 = vrot.slane %v513_v7, %v1727_v62  ;;  %v536_v21 = vrot.slane %v514_v8, %v1727_v62  ;;  %v777_v22 = vrot.slane %v1654_v18, %v1695_v48 }
 0x106   : > { %v543_v23 = vrot.slane %v515_v9, %v1727_v62  ;;  %v781_v24 = vrot.slane %v1654_v18, %v1698_v49  ;;  %v785_v25 = vrot.slane %v1654_v18, %v1701_v50  ;;  %v789_v26 = vrot.slane %v1654_v18, %v1704_v51 }
 0x107   : > { %v944_v27 = vcombine.low %v936_v6, %v943_v20  ;;  %v544_v28 = vcombine.low %v522_v10, %v529_v12  ;;  %v793_v29 = vrot.slane %v1654_v18, %v1707_v52  ;;  %v797_v15 = vrot.slane %v1654_v18, %v1710_v53 }
 0x108   : > { %v545_v30 = vcombine.low %v536_v21, %v543_v23  ;;  %v945_v31 = vcombine.low %v769_v11, %v773_v17  ;;  %v946_v32 = vcombine.low %v777_v22, %v781_v24  ;;  %v947_v33 = vcombine.low %v785_v25, %v789_v26 }
 0x109   : > { %1001 = vperm.xlu1 %1308, %v944_v27   ;;  %v552_v34 = vrot.slane %v544_v28, %v1727_v62  ;;  %v948_v13 = vcombine.low %v793_v29, %v797_v15  ;;  %v385_v35 = vrot.slane %v1646_v14, %v1689_v46  ;;  %v389_v36 = vrot.slane %v1646_v14, %v1692_v47 }
 0x10a   : > { %v559_v37 = vrot.slane %v545_v30, %v1727_v62  ;;  %v955_v38 = vrot.slane %v945_v31, %v1727_v62  ;;  %v962_v18 = vrot.slane %v946_v32, %v1727_v62  ;;  %v969_v39 = vrot.slane %v947_v33, %v1727_v62  ;;  %v665_v30 = vld [vmem:[%s1662_s29] sm:$0x1] }
 0x10b   : > { %v976_v40 = vrot.slane %v948_v13, %v1727_v62  ;;  %v393_v41 = vrot.slane %v1646_v14, %v1695_v48  ;;  %v397_v43 = vrot.slane %v1646_v14, %v1698_v49  ;;  %v401_v46 = vrot.slane %v1646_v14, %v1701_v50 }
 0x10c   : > { %v560_v47 = vcombine.low %v552_v34, %v559_v37  ;;  %v977_v44 = vcombine.low %v955_v38, %v962_v18  ;;  %v405_v45 = vrot.slane %v1646_v14, %v1704_v51  ;;  %v409_v54 = vrot.slane %v1646_v14, %v1707_v52  ;;  %v281_v38 = vld [vmem:[%s1659_s28] sm:$0x1] }
 0x10d   : > { %v978_v55 = vcombine.low %v969_v39, %v976_v40  ;;  %v413_v56 = vrot.slane %v1646_v14, %v1710_v53  ;;  %v561_v19 = vcombine.low %v385_v35, %v389_v36  ;;  %v562_v48 = vcombine.low %v393_v41, %v397_v43 }
 0x10e   : > { %617 = vperm.xlu0 %1307, %v560_v47   ;;  %v985_v49 = vrot.slane %v977_v44, %v1727_v62  ;;  %v563_v57 = vcombine.low %v401_v46, %v405_v45  ;;  %v626_v5 = vadd.s32 4294967288, %v1636_v1  ;;  %v633_v6 = vadd.s32 4294967280, %v1636_v1 }
 0x10f   : > { %v992_v50 = vrot.slane %v978_v55, %v1727_v62  ;;  %v564_v58 = vcombine.low %v409_v54, %v413_v56  ;;  %v571_v59 = vrot.slane %v561_v19, %v1727_v62  ;;  %v578_v51 = vrot.slane %v562_v48, %v1727_v62 }
 0x110   : > { %v585_v60 = vrot.slane %v563_v57, %v1727_v62  ;;  %v629_v7 = vsub.s32 %v626_v5, %v1686_v42  ;;  %v640_v8 = vadd.s32 4294967272, %v1636_v1  ;;  %v636_v10 = vsub.s32 %v633_v6, %v1686_v42 }
 0x111   : > { %v993_v52 = vcombine.low %v985_v49, %v992_v50  ;;  %v592_v61 = vrot.slane %v564_v58, %v1727_v62  ;;  %v593_v63 = vcombine.low %v571_v59, %v578_v51  ;;  %v624_v17 = vsub.s32 %v1636_v1, %v1686_v42 }
 0x112   : > { %v643_v12 = vsub.s32 %v640_v8, %v1686_v42 }
 0x113   : > { %1004 = vperm.xlu1 %1308, %v993_v52   ;;  %v594_v14 = vcombine.low %v585_v60, %v592_v61  ;;  %v601_v53 = vrot.slane %v593_v63, %v1727_v62 }
 0x115   : > { %v608_v0 = vrot.slane %v594_v14, %v1727_v62 }
 0x117   : > { %v609_v16 = vcombine.low %v601_v53, %v608_v0 }
 0x119   : > { %620 = vperm.xlu0 %1307, %v609_v16  }
 0x170   : > { %v996_v2 = vpop.permute.xlu1 %995 }
 0x171   : > { %v1009_v22 = vrot.slane %v996_v2, %v624_v17 }
 0x174   : > { %v612_v3 = vpop.permute.xlu0 %611 }
 0x175   : > { %v625_v15 = vrot.slane %v612_v3, %v624_v17 }
 0x179   : > { %v999_v4 = vpop.permute.xlu1 %998 }
 0x17a   : > { %v1013_v20 = vrot.slane %v999_v4, %v629_v7 }
 0x17c   : > { %v1014_v25 = vsel %vm631_vm5, %v1013_v20, %v1009_v22 }
 0x17f   : > { %v615_v9 = vpop.permute.xlu0 %614 }
 0x180   : > { %v630_v28 = vrot.slane %v615_v9, %v629_v7 }
 0x182   : > { %v632_v33 = vsel %vm631_vm5, %v630_v28, %v625_v15 }
 0x184   : > { %v1002_v11 = vpop.permute.xlu1 %1001 }
 0x185   : > { %v1018_v21 = vrot.slane %v1002_v11, %v636_v10 }
 0x187   : > { %v1019_v27 = vsel %vm638_vm6, %v1018_v21, %v1014_v25 }
 0x189   : > { %v618_v23 = vpop.permute.xlu0 %617 }
 0x18a   : > { %v637_v29 = vrot.slane %v618_v23, %v636_v10 }
 0x18c   : > { %v639_v13 = vsel %vm638_vm6, %v637_v29, %v632_v33 }
 0x18e   : > { %v1005_v24 = vpop.permute.xlu1 %1004 }
 0x18f   : > { %v1023_v26 = vrot.slane %v1005_v24, %v643_v12 }
 0x191   : > { %v1024_v1 = vsel %vm645_vm7, %v1023_v26, %v1019_v27 }
 0x192   : > { %v1031_v42 = vrot.slane %v1024_v1, %v1727_v62 }
 0x194   : > { %v1038_v31 = vrot.slane %v1031_v42, %v1727_v62  ;;  %v621_v32 = vpop.permute.xlu0 %620 }
 0x195   : > { %v644_v34 = vrot.slane %v621_v32, %v643_v12 }
 0x196   : > { %v1040_v35 = vmax.f32 %v665_v30, %v1038_v31 }
 0x197   : > { %v646_v36 = vsel %vm645_vm7, %v644_v34, %v639_v13 }
 0x198   : > { %1041 = vst.msk [vmem:[%s1662_s29] sm:$0x1] %vm663_vm8, %v1040_v35  ;;  %v653_v37 = vrot.slane %v646_v36, %v1727_v62 }
 0x19a   : > { %v660_v18 = vrot.slane %v653_v37, %v1727_v62 }
 0x19c   : > { %v662_v39 = vadd.f32 %v660_v18, %v281_v38 }
 0x19e   : > { %664 = vst.msk [vmem:[%s1659_s28] sm:$0x1] %vm663_vm8, %v662_v39 }
 0x19f PF: > { %s1191_s15 = sshll.u32 %s1475_s16, 4  ;;  %s1059_s20 = sshll.u32 %s1659_s28, 4  ;;  %s1060_s20 = int_to_ptr.vmem [resolvable:$true] %s1059_s20 }
 0x1a0   : > { %s1057_s12 = scalar_lea.hbm %s1990_s1, %s1191_s15  ;;  %s1043_s23 = scalar_lea.sflag [#allocation4], %s1640_s22 }
 0x1a1   : > { %s1337_s26 = scalar_lea.vmem %s1060_s20, 16  ;;  %s1495_s7 = smov [#allocation5]  }
 0x1a2   : > { %p1338_p6 = scmp.ne.s32.totalorder %s1060_s20, %s1337_s26  ;;  %s1341_s25 = sshll.u32 %s1495_s7, 4  ;;  %s1342_s25 = int_to_ptr.vmem [resolvable:$false] %s1341_s25 }
 0x1a3   : > { %s1343_s30 = scalar_lea.vmem %s1342_s25, 32  ;;  %p1344_p10 = scmp.lt.s32.totalorder %s1060_s20, %s1342_s25 }
 0x1a4   : > { %p1339_p8 = pnand %p1338_p6, %p1594_p12  ;;  %p1345_p11 = scmp.lt.s32.totalorder %s1343_s30, %s1337_s26 }
 0x1a6   : > { %p1340_p9 = pneg %p1339_p8  ;;  %p1346_p13 = por %p1345_p11, %p1344_p10 }
 0x1a8   : > { %p1347_p0 = pnand %p1346_p13, %p1340_p9 }
 0x1aa   : > { %1350 = shalt.err (!%p1347_p0)
}
 0x1ab   : > { %s1351_s5 = scalar_lea.hbm %s1057_s12, 16  ;;  %s1355_s28 = scalar_lea.hbm %s1990_s1, 32 }
 0x1ac   : > { %p1352_p3 = scmp.ne.s32.totalorder %s1057_s12, %s1351_s5  ;;  %p1356_p7 = scmp.lt.s32.totalorder %s1057_s12, %s1990_s1 }
 0x1ad   : > { %p1357_p4 = scmp.lt.s32.totalorder %s1355_s28, %s1351_s5 }
 0x1ae   : > { %p1353_p1 = pnand %p1352_p3, %p1594_p12 }
 0x1af   : > { %p1358_p6 = por %p1357_p4, %p1356_p7 }
 0x1b0   : > { %p1354_p5 = pneg %p1353_p1 }
 0x1b2   : > { %p1359_p8 = pnand %p1358_p6, %p1354_p5 }
 0x1b4   : > { %1362 = shalt.err (!%p1359_p8)
}
 0x1b5   : > { %1197 = dma.vmem_to_hbm [thread:$0]  (%p1594_p12), %s1060_s20, 16, %s1057_s12, %s1043_s23  }
 0x1b6   : > { %s1070_s25 = scalar_lea.hbm %s1991_s2, %s1191_s15  ;;  %s1072_s30 = sshll.u32 %s1662_s29, 4  ;;  %s1073_s30 = int_to_ptr.vmem [resolvable:$true] %s1072_s30 }
 0x1b7   : > { %s1047_s27 = scalar_lea.sflag [#allocation7], %s1640_s22  ;;  %s1363_s8 = scalar_lea.vmem %s1073_s30, 16 }
 0x1b8   : > { %p1364_p9 = scmp.ne.s32.totalorder %s1073_s30, %s1363_s8  ;;  %s1496_s5 = smov [#allocation6]  }
 0x1b9   : > { %s1367_s28 = sshll.u32 %s1496_s5, 4  ;;  %s1368_s28 = int_to_ptr.vmem [resolvable:$false] %s1367_s28 }
 0x1ba   : > { %p1365_p10 = pnand %p1364_p9, %p1594_p12  ;;  %s1369_s24 = scalar_lea.vmem %s1368_s28, 32 }
 0x1bb   : > { %p1370_p13 = scmp.lt.s32.totalorder %s1073_s30, %s1368_s28  ;;  %p1371_p0 = scmp.lt.s32.totalorder %s1369_s24, %s1363_s8 }
 0x1bc   : > { %p1366_p11 = pneg %p1365_p10 }
 0x1bd   : > { %p1372_p3 = por %p1371_p0, %p1370_p13 }
 0x1bf   : > { %p1373_p1 = pnand %p1372_p3, %p1366_p11 }
 0x1c1   : > { %1376 = shalt.err (!%p1373_p1)
}
 0x1c2   : > { %s1377_s16 = scalar_lea.hbm %s1070_s25, 16  ;;  %s1381_s15 = scalar_lea.hbm %s1991_s2, 32 }
 0x1c3   : > { %p1378_p5 = scmp.ne.s32.totalorder %s1070_s25, %s1377_s16  ;;  %p1382_p6 = scmp.lt.s32.totalorder %s1070_s25, %s1991_s2 }
 0x1c4   : > { %p1383_p8 = scmp.lt.s32.totalorder %s1381_s15, %s1377_s16 }
 0x1c5   : > { %p1379_p7 = pnand %p1378_p5, %p1594_p12 }
 0x1c6   : > { %p1384_p9 = por %p1383_p8, %p1382_p6 }
 0x1c7   : > { %p1380_p4 = pneg %p1379_p7 }
 0x1c9   : > { %p1385_p10 = pnand %p1384_p9, %p1380_p4 }
 0x1cb   : > { %1388 = shalt.err (!%p1385_p10)
}
 0x1cc   : > { %1198 = dma.vmem_to_hbm [thread:$0]  (%p1594_p12), %s1073_s30, 16, %s1070_s25, %s1047_s27  }
 0x1cd PF: > { %p1213_p11 = scmp.ge.s32.totalorder %s1487_s19, 2  ;;  %s1084_s23 = sand.u32 1, %s1447_s9  }
 0x1ce   : > { %s1085_s21 = scalar_lea.sflag [#allocation4], %s1084_s23 }
 0x1cf   : > { %p1206_p13 = pnand %p1213_p11, %p1607_p2 }
 0x1d1   : > { %p1207_p0 = pneg %p1206_p13 }
 0x1d3   : > { %1438 = dma.done.wait (%p1207_p0), %s1085_s21, 16  }
 0x1d4   : > { %1440 = vsyncadd (%p1207_p0), %s1085_s21, 4294967280  ;;  %s1093_s26 = scalar_lea.sflag [#allocation7], %s1084_s23 }
 0x1d5   : > { %1442 = dma.done.wait (%p1207_p0), %s1093_s26, 16  }
 0x1d6   : > { %1444 = vsyncadd (%p1207_p0), %s1093_s26, 4294967280  ;;  %s22_s19 = sadd.s32 1, %s1487_s19   ;;  %s2002_s3 = sld [smem:[#allocation13_spill]] }
 0x1d7   : > { %p19_p3 = scmp.ge.s32.totalorder %s22_s19, 6   ;;  %s2003_s6 = sld [smem:[#allocation11_spill]] }
 0x1d8   : > { %s2004_s7 = sld [smem:[#allocation12_spill]]  ;;  %s2005_s9 = smov %s1451_s10 }
 0x1d9   : > { %s2006_s10 = smov %s1455_s11  ;;  %s2007_s11 = smov %s1599_s4 }
 0x1da   : > { %s2008_s12 = smov %s1463_s13  ;;  %s2009_s13 = smov %s1467_s14 }
 0x1db   : > { %s2011_s15 = smov %s1479_s17  ;;  %s2012_s16 = smov %s1483_s18 }
 0x1dc   : > { %s2010_s14 = smov %s2002_s3  ;;  %21 = sbr.rel (!%p19_p3) target bundleno = 11 (0xb), region = 94 }
 0x1dd   : > { %s2013_s17 = smov %s2003_s6 }
 0x1de   : > { %s2014_s18 = smov %s2004_s7 }
 0x1e1   :  { %1097 = vsyncpa [#allocation3], 1 }
 0x1e2   :  { %1099 = vsyncpa [#allocation3 + $0x1], 1 }
 0x1e3   :  { %1100 = vsyncpa [#allocation4], 1 }
 0x1e4   :  { %1102 = vsyncpa [#allocation4 + $0x1], 1 }
 0x1e5   :  { %1103 = vsyncpa [#allocation7], 1 }
 0x1e6   :  { %1105 = vsyncpa [#allocation7 + $0x1], 1 }

</bundles_post_ra>
